<compile_context>
chip_gen: v5e
topology: v5e:2x2
jax: 0.10.0
libtpu: 0.0.40
codegen_flags: <defaults>
</compile_context>

<pallas_src>
import functools

import jax
import jax.numpy as jnp
import numpy as np
from jax.experimental import pallas as pl
from jax.experimental.pallas import tpu as pltpu

HID = 64          # hid_dim
NUM_LAYERS = 3    # layer_num


def _round_up(n, m):
    return ((n + m - 1) // m) * m


def _vmem_capacity_bytes():
    """Per-core VMEM capacity; conservative 64 MiB fallback (v7x) if the query fails."""
    try:
        info = pltpu.get_tpu_info()
        cap = getattr(info, "vmem_capacity_bytes", None)
        if cap:
            return int(cap)
    except Exception:
        pass
    return 64 * 1024 * 1024


def _plan_tiling(n_nodes, num_graphs):
    """Generation-scaled VMEM budgeting: resident A (tm = Np) when it fits, else stream."""
    cap = _vmem_capacity_bytes()
    vmem_limit = int(min(cap * 0.85, cap - (6 << 20)))     # ~108 MiB on 128 MiB, ~54 MiB on 64 MiB

    np8 = _round_up(max(n_nodes, 8), 8)
    g = max(int(num_graphs), 1)
    # Fixed residents (bytes); conservatively assume the pipeline double-buffers every input.
    bytes_h = 2 * np8 * HID * 2                                        # (2, Np, HID) bf16 scratch
    bytes_x = 2 * np8 * HID * 2                                        # x resident (bf16)
    bytes_pool = 2 * g * np8 * 2 + 2 * g * HID * 4                     # one-hot bf16 + 1/count f32
    bytes_w = 2 * (NUM_LAYERS * (2 * HID * HID * 2 + 2 * HID * 4)      # GIN weights bf16 + biases f32
                   + 2 * HID * HID * 2 + 2 * HID * 4)                  # projection head
    bytes_out = 2 * g * HID * 4
    headroom = 6 << 20                                                 # compiler scratch / spills
    fixed = bytes_h + bytes_x + bytes_pool + bytes_w + bytes_out + headroom

    avail_a = max(vmem_limit - fixed, 1 << 20)
    if 2 * np8 * np8 * 2 <= avail_a:        # full A (double-buffered, bf16) fits -> resident
        tm = np8
    else:                                    # streaming fallback: 2 buffers x (tm, Np) bf16
        tm = avail_a // (2 * 2 * np8)
        tm = max(8, min(2048, (tm // 8) * 8))
    return int(tm), vmem_limit


def pipeline_kernel(*refs, apply_eps, tm, num_blocks):
    """Grid = (layer, row_block)."""
    if apply_eps:
        eps_ref, refs = refs[0], refs[1:]
    (x_ref, a_ref, p_ref, inv_ref, w1_ref, b1_ref, w2_ref, b2_ref,
     pw_ref, pb_ref, out_ref, h_ref) = refs

    l = pl.program_id(0)                 # GIN layer
    i = pl.program_id(1)                 # node row block
    n_layers = pl.num_programs(0)

    read_slot = l % 2                    # previous-layer slot
    write_slot = (l + 1) % 2             # current-layer slot
    row0 = pl.multiple_of(i * tm, tm)

    # Stage the (padded) node features into ping-pong slot 0 before layer 0 runs.
    @pl.when((l == 0) & (i == 0))
    def _():
        h_ref[0] = x_ref[...]

    # GIN aggregation for this row block: (1 + eps) * h_rows + A_rows @ h   (f32 accumulate)
    h_full = h_ref[read_slot]                                             # [Np, HID] bf16 view
    agg = jnp.dot(a_ref[...], h_full, preferred_element_type=jnp.float32)  # [tm, HID] f32
    h_rows = h_ref[read_slot, pl.ds(row0, tm), :].astype(jnp.float32)
    if apply_eps:                        # statically skipped when eps == 0 (GINConv default)
        h_rows = (1.0 + eps_ref[l]) * h_rows
    agg = agg + h_rows

    # Per-layer GIN MLP: Linear -> ReLU -> Linear -> ReLU (resident weights, layer picked by l).
    z = jnp.dot(agg.astype(jnp.bfloat16), w1_ref[l],
                preferred_element_type=jnp.float32) + b1_ref[l]
    z = jnp.maximum(z, 0.0)
    z = jnp.dot(z.astype(jnp.bfloat16), w2_ref[l],
                preferred_element_type=jnp.float32) + b2_ref[l]
    h_new = jnp.maximum(z, 0.0)
    h_ref[write_slot, pl.ds(row0, tm), :] = h_new.astype(jnp.bfloat16)

    # Finalize once: global mean pool (bf16 one-hot @ h, f32 1/count) + projection head.
    @pl.when((l == n_layers - 1) & (i == num_blocks - 1))
    def _():
        h_final = h_ref[write_slot]                                       # [Np, HID] bf16
        pooled = jnp.dot(p_ref[...], h_final,
                         preferred_element_type=jnp.float32)              # [G, HID] sums
        pooled = pooled * inv_ref[...]                                    # mean (f32 scale)
        z1 = jnp.dot(pooled.astype(jnp.bfloat16), pw_ref[0],
                     preferred_element_type=jnp.float32) + pb_ref[0]
        z1 = jax.nn.gelu(z1)
        pre = jnp.dot(z1.astype(jnp.bfloat16), pw_ref[1],
                      preferred_element_type=jnp.float32) + pb_ref[1]
        out_ref[...] = pre                                                # col 0 is the real output


def build_dense_graph(edge_index, batch, num_nodes, num_graphs):
    """Glue: dense adjacency (GIN sum aggregation), 0/1 one-hot pooling matrix, node counts."""
    src = edge_index[0]
    dst = edge_index[1]
    A = jnp.zeros((num_nodes, num_nodes), jnp.float32).at[dst, src].add(1.0)
    onehot = (batch[None, :] == jnp.arange(num_graphs, dtype=batch.dtype)[:, None]).astype(jnp.float32)
    counts = jnp.maximum(onehot.sum(axis=1, keepdims=True), 1.0)
    return A, onehot, counts


def _pack_params(params, input_dim):
    """Consolidate the 16 small operands into 6 resident slabs; weights bf16, biases f32."""
    dims_in = [input_dim, HID, HID]
    w1s, b1s, w2s, b2s = [], [], [], []
    for l in range(NUM_LAYERS):
        w1, b1, w2, b2 = params[4 * l:4 * l + 4]
        w1p = jnp.zeros((HID, HID), jnp.float32).at[:dims_in[l], :].set(w1)
        w1s.append(w1p)
        b1s.append(b1.reshape(1, HID))
        w2s.append(w2)
        b2s.append(b2.reshape(1, HID))
    wfc1, bfc1, wfc2, bfc2 = params[4 * NUM_LAYERS:4 * NUM_LAYERS + 4]
    wfc2p = jnp.zeros((HID, HID), jnp.float32).at[:, :1].set(wfc2)
    bfc2p = jnp.zeros((1, HID), jnp.float32).at[:, :1].set(bfc2)
    w1_stack = jnp.stack(w1s).astype(jnp.bfloat16)             # (L, HID, HID)
    w2_stack = jnp.stack(w2s).astype(jnp.bfloat16)             # (L, HID, HID)
    b1_stack = jnp.stack(b1s)                                  # (L, 1, HID) f32
    b2_stack = jnp.stack(b2s)                                  # (L, 1, HID) f32
    proj_w = jnp.stack([wfc1, wfc2p]).astype(jnp.bfloat16)     # (2, HID, HID)
    proj_b = jnp.stack([bfc1.reshape(1, HID), bfc2p])          # (2, 1, HID) f32
    return w1_stack, b1_stack, w2_stack, b2_stack, proj_w, proj_b


def pipeline_forward(x, edge_index, batch, num_graphs, params, eps=None, tm=None):
    N, F = x.shape
    assert F <= HID, "TODO(synk): tile layer-0 input features when input_dim > hid_dim"

    plan_tm, vmem_limit = _plan_tiling(N, num_graphs)
    if tm is None:
        tm = plan_tm
    tm = max(8, (int(tm) // 8) * 8)
    tm = min(tm, _round_up(N, 8))
    Np = _round_up(N, tm)
    nb = Np // tm

    # Glue: dense A / one-hot pooling, zero-padded to Np nodes (padded nodes have no edges and
    # zero pooling weight, so they never affect the output).  A / features / one-hot -> bf16
    # (exact small integer / 0-1 values); biases, 1/count and all accumulations stay f32.
    A, onehot, counts = build_dense_graph(edge_index, batch, N, num_graphs)
    A = jnp.zeros((Np, Np), jnp.float32).at[:N, :N].set(A).astype(jnp.bfloat16)
    P = jnp.zeros((num_graphs, Np), jnp.float32).at[:, :N].set(onehot).astype(jnp.bfloat16)
    inv_cnt = jnp.broadcast_to(1.0 / counts, (num_graphs, HID)).astype(jnp.float32)
    x_pad = jnp.zeros((Np, HID), jnp.float32).at[:N, :F].set(x).astype(jnp.bfloat16)

    w1s, b1s, w2s, b2s, proj_w, proj_b = _pack_params(params, F)

    apply_eps = eps is not None                      # GINConv default eps = 0 -> skip the scale
    operands = [x_pad, A, P, inv_cnt, w1s, b1s, w2s, b2s, proj_w, proj_b]
    in_specs = [
        pl.BlockSpec((Np, HID), lambda l, i: (0, 0)),                 # x (resident)
        pl.BlockSpec((tm, Np), lambda l, i: (i, 0)),                  # A: resident when tm == Np
        pl.BlockSpec((num_graphs, Np), lambda l, i: (0, 0)),          # one-hot pool (resident)
        pl.BlockSpec((num_graphs, HID), lambda l, i: (0, 0)),         # 1/count scale (resident)
        pl.BlockSpec((NUM_LAYERS, HID, HID), lambda l, i: (0, 0, 0)), # all w1 (resident)
        pl.BlockSpec((NUM_LAYERS, 1, HID), lambda l, i: (0, 0, 0)),   # all b1 (resident)
        pl.BlockSpec((NUM_LAYERS, HID, HID), lambda l, i: (0, 0, 0)), # all w2 (resident)
        pl.BlockSpec((NUM_LAYERS, 1, HID), lambda l, i: (0, 0, 0)),   # all b2 (resident)
        pl.BlockSpec((2, HID, HID), lambda l, i: (0, 0, 0)),          # projection weights
        pl.BlockSpec((2, 1, HID), lambda l, i: (0, 0, 0)),            # projection biases
    ]
    if apply_eps:
        operands = [jnp.asarray(eps, jnp.float32).reshape(NUM_LAYERS)] + operands
        in_specs = [pl.BlockSpec(memory_space=pltpu.MemorySpace.SMEM)] + in_specs

    kernel = functools.partial(pipeline_kernel, apply_eps=apply_eps, tm=tm, num_blocks=nb)

    grid_spec = pltpu.PrefetchScalarGridSpec(
        num_scalar_prefetch=0,
        grid=(NUM_LAYERS, nb),
        in_specs=in_specs,
        out_specs=pl.BlockSpec((num_graphs, HID), lambda l, i: (0, 0)),
        scratch_shapes=[pltpu.VMEM((2, Np, HID), jnp.bfloat16)],   # h ping-pong carry
    )

    out = pl.pallas_call(
        kernel,
        out_shape=jax.ShapeDtypeStruct((num_graphs, HID), jnp.float32),
        grid_spec=grid_spec,
        compiler_params=pltpu.CompilerParams(
            # Both axes "arbitrary": layer l+1 needs the full layer-l node state carried in
            # this core's VMEM scratch, so neither axis can be split across TensorCores.
            dimension_semantics=("arbitrary", "arbitrary"),
            vmem_limit_bytes=vmem_limit,
        ),
    )(*operands)

    pre = out[:, :1]                                  # lane-dense slab -> (G, 1) result
    reg = 0
    return pre, reg


def reference_forward(x, edge_index, batch, num_graphs, eps, params):
    """Pure-JAX f32 reference with identical forward semantics."""
    N, _ = x.shape
    A, onehot, counts = build_dense_graph(edge_index, batch, N, num_graphs)
    P = onehot / counts
    h = x
    for l in range(NUM_LAYERS):
        w1, b1, w2, b2 = params[4 * l:4 * l + 4]
        agg = (1.0 + eps[l]) * h + A @ h
        z = jnp.maximum(agg @ w1 + b1, 0.0)
        h = jnp.maximum(z @ w2 + b2, 0.0)
    pooled = P @ h
    wfc1, bfc1, wfc2, bfc2 = params[4 * NUM_LAYERS:4 * NUM_LAYERS + 4]
    z = jax.nn.gelu(pooled @ wfc1 + bfc1)
    return z @ wfc2 + bfc2, 0


def init_params(key, input_dim):
    """Deterministic synthetic parameter init (3 GIN MLPs + projection Mlp)."""
    params = []
    dims_in = [input_dim, HID, HID]
    k = key
    for l in range(NUM_LAYERS):
        k, k1, k2 = jax.random.split(k, 3)
        params.append(0.1 * jax.random.normal(k1, (dims_in[l], HID), jnp.float32))  # w1
        params.append(jnp.zeros((1, HID), jnp.float32))                             # b1
        params.append(0.1 * jax.random.normal(k2, (HID, HID), jnp.float32))         # w2
        params.append(jnp.zeros((1, HID), jnp.float32))                             # b2
    k, k1, k2 = jax.random.split(k, 3)
    params.append(0.1 * jax.random.normal(k1, (HID, HID), jnp.float32))              # fc1 w
    params.append(jnp.zeros((1, HID), jnp.float32))                                  # fc1 b
    params.append(0.1 * jax.random.normal(k2, (HID, 1), jnp.float32))                # fc2 w
    params.append(jnp.zeros((1, 1), jnp.float32))                                    # fc2 b
    return params


if __name__ == "__main__":
    key = jax.random.PRNGKey(0)
    N, F, G, E = 16, 8, 2, 32   # nodes, input_dim, graphs in batch, edges

    kx, ks, kd, kp = jax.random.split(key, 4)
    x = jax.random.normal(kx, (N, F), jnp.float32)
    src = jax.random.randint(ks, (E,), 0, N, dtype=jnp.int32)
    dst = jax.random.randint(kd, (E,), 0, N, dtype=jnp.int32)
    edge_index = jnp.stack([src, dst], axis=0)                      # [2, E]
    batch = jnp.concatenate([jnp.zeros(N // 2, jnp.int32),
                             jnp.ones(N - N // 2, jnp.int32)])      # node -> graph id

    params = init_params(kp, F)

    eps0 = jnp.zeros((NUM_LAYERS,), jnp.float32)
    pre_ref, _ = reference_forward(x, edge_index, batch, G, eps0, params)

    # Auto-planned path: A fits VMEM at this size -> resident-A (tm = Np, single row block).
    pre, reg = pipeline_forward(x, edge_index, batch, G, params, eps=None)
    pre = jax.block_until_ready(pre)
    np.testing.assert_allclose(np.asarray(pre), np.asarray(pre_ref), rtol=2e-2, atol=2e-2)
    assert pre.shape == (G, 1) and reg == 0

    # Forced small tile: exercises the streaming fallback (2 row blocks per layer).
    pre_s, _ = pipeline_forward(x, edge_index, batch, G, params, eps=None, tm=8)
    pre_s = jax.block_until_ready(pre_s)
    np.testing.assert_allclose(np.asarray(pre_s), np.asarray(pre_ref), rtol=2e-2, atol=2e-2)

    print("KERNEL_OK")
</pallas_src>

<mosaic_0001>
module attributes {stable_mosaic.version = 11 : i64} {
  func.func @pipeline_kernel(%arg0: i32, %arg1: i32, %arg2: memref<16x64xbf16, #tpu.memory_space<vmem>>, %arg3: memref<16x16xbf16, #tpu.memory_space<vmem>>, %arg4: memref<2x16xbf16, #tpu.memory_space<vmem>>, %arg5: memref<2x64xf32, #tpu.memory_space<vmem>>, %arg6: memref<3x64x64xbf16, #tpu.memory_space<vmem>>, %arg7: memref<3x1x64xf32, #tpu.memory_space<vmem>>, %arg8: memref<3x64x64xbf16, #tpu.memory_space<vmem>>, %arg9: memref<3x1x64xf32, #tpu.memory_space<vmem>>, %arg10: memref<2x64x64xbf16, #tpu.memory_space<vmem>>, %arg11: memref<2x1x64xf32, #tpu.memory_space<vmem>>, %arg12: memref<2x64xf32, #tpu.memory_space<vmem>>, %arg13: memref<2x16x64xbf16, #tpu.memory_space<vmem>>) attributes {dimension_semantics = [#tpu.dimension_semantics<arbitrary>, #tpu.dimension_semantics<arbitrary>], iteration_bounds = array<i64: 3, 1>, scalar_prefetch = 0 : i64, scratch_operands = 1 : i64, tpu.core_type = #tpu.core_type<tc>, window_params = [{pipeline_mode = #tpu.pipeline_mode<synchronous>, transform_indices = @transform_0, window_bounds = array<i64: 16, 64>}, {transform_indices = @transform_1, window_bounds = array<i64: 16, 16>}, {pipeline_mode = #tpu.pipeline_mode<synchronous>, transform_indices = @transform_2, window_bounds = array<i64: 2, 16>}, {pipeline_mode = #tpu.pipeline_mode<synchronous>, transform_indices = @transform_3, window_bounds = array<i64: 2, 64>}, {pipeline_mode = #tpu.pipeline_mode<synchronous>, transform_indices = @transform_4, window_bounds = array<i64: 3, 64, 64>}, {pipeline_mode = #tpu.pipeline_mode<synchronous>, transform_indices = @transform_5, window_bounds = array<i64: 3, 1, 64>}, {pipeline_mode = #tpu.pipeline_mode<synchronous>, transform_indices = @transform_6, window_bounds = array<i64: 3, 64, 64>}, {pipeline_mode = #tpu.pipeline_mode<synchronous>, transform_indices = @transform_7, window_bounds = array<i64: 3, 1, 64>}, {pipeline_mode = #tpu.pipeline_mode<synchronous>, transform_indices = @transform_8, window_bounds = array<i64: 2, 64, 64>}, {pipeline_mode = #tpu.pipeline_mode<synchronous>, transform_indices = @transform_9, window_bounds = array<i64: 2, 1, 64>}, {pipeline_mode = #tpu.pipeline_mode<synchronous>, transform_indices = @transform_10, window_bounds = array<i64: 2, 64>}]} {
    %c2_i32 = arith.constant 2 : i32
    %c0_i32 = arith.constant 0 : i32
    %0 = arith.cmpi eq, %c2_i32, %c0_i32 : i32
    %c1_i32 = arith.constant 1 : i32
    %1 = arith.select %0, %c1_i32, %c2_i32 : i32
    %2 = arith.remsi %arg0, %1 : i32
    %c0_i32_0 = arith.constant 0 : i32
    %3 = arith.cmpi ne, %2, %c0_i32_0 : i32
    %c0_i32_1 = arith.constant 0 : i32
    %4 = arith.cmpi slt, %2, %c0_i32_1 : i32
    %c0_i32_2 = arith.constant 0 : i32
    %5 = arith.cmpi slt, %1, %c0_i32_2 : i32
    %6 = arith.xori %4, %5 : i1
    %7 = arith.andi %6, %3 : i1
    %8 = arith.addi %2, %1 : i32
    %9 = arith.select %7, %8, %2 : i32
    %c1_i32_3 = arith.constant 1 : i32
    %10 = arith.addi %arg0, %c1_i32_3 : i32
    %c2_i32_4 = arith.constant 2 : i32
    %c0_i32_5 = arith.constant 0 : i32
    %11 = arith.cmpi eq, %c2_i32_4, %c0_i32_5 : i32
    %c1_i32_6 = arith.constant 1 : i32
    %12 = arith.select %11, %c1_i32_6, %c2_i32_4 : i32
    %13 = arith.remsi %10, %12 : i32
    %c0_i32_7 = arith.constant 0 : i32
    %14 = arith.cmpi ne, %13, %c0_i32_7 : i32
    %c0_i32_8 = arith.constant 0 : i32
    %15 = arith.cmpi slt, %13, %c0_i32_8 : i32
    %c0_i32_9 = arith.constant 0 : i32
    %16 = arith.cmpi slt, %12, %c0_i32_9 : i32
    %17 = arith.xori %15, %16 : i1
    %18 = arith.andi %17, %14 : i1
    %19 = arith.addi %13, %12 : i32
    %20 = arith.select %18, %19, %13 : i32
    %c16_i32 = arith.constant 16 : i32
    %21 = arith.muli %arg1, %c16_i32 : i32
    %22 = tpu.assume_multiple %21, 16 : i32
    %c0_i32_10 = arith.constant 0 : i32
    %23 = arith.cmpi eq, %arg0, %c0_i32_10 : i32
    %c0_i32_11 = arith.constant 0 : i32
    %24 = arith.cmpi eq, %arg1, %c0_i32_11 : i32
    %25 = arith.andi %23, %24 : i1
    %26 = arith.extui %25 : i1 to i32
    %c0_i32_12 = arith.constant 0 : i32
    %27 = arith.cmpi ne, %26, %c0_i32_12 : i32
    scf.if %27 {
      %c0_33 = arith.constant 0 : index
      %c0_34 = arith.constant 0 : index
      %74 = vector.load %arg2[%c0_33, %c0_34] : memref<16x64xbf16, #tpu.memory_space<vmem>>, vector<16x64xbf16>
      %c0_35 = arith.constant 0 : index
      %c0_36 = arith.constant 0 : index
      %c0_37 = arith.constant 0 : index
      %75 = vector.load %arg13[%c0_35, %c0_36, %c0_37] : memref<2x16x64xbf16, #tpu.memory_space<vmem>>, vector<1x16x64xbf16>
      %76 = vector.shape_cast %75 : vector<1x16x64xbf16> to vector<16x64xbf16>
      %77 = vector.shape_cast %74 : vector<16x64xbf16> to vector<1x16x64xbf16>
      tpu.vector_store %arg13[%c0_35, %c0_36, %c0_37], %77 {strides = array<i32>} : memref<2x16x64xbf16, #tpu.memory_space<vmem>>, vector<1x16x64xbf16>,
    } else {
    }
    %28 = arith.index_cast %9 : i32 to index
    %c0 = arith.constant 0 : index
    %c0_13 = arith.constant 0 : index
    %29 = vector.load %arg13[%28, %c0, %c0_13] : memref<2x16x64xbf16, #tpu.memory_space<vmem>>, vector<1x16x64xbf16>
    %30 = vector.shape_cast %29 : vector<1x16x64xbf16> to vector<16x64xbf16>
    %c0_14 = arith.constant 0 : index
    %c0_15 = arith.constant 0 : index
    %31 = vector.load %arg3[%c0_14, %c0_15] : memref<16x16xbf16, #tpu.memory_space<vmem>>, vector<16x16xbf16>
    %cst = arith.constant dense<0.000000e+00> : vector<16x64xf32>
    %32 = tpu.matmul %31, %30, %cst {dimension_numbers = #tpu.dot_dimension_numbers<[1], [0], [0], [1], [0, 0, 1, 1], [], []>} : vector<16x16xbf16>, vector<16x64xbf16>, vector<16x64xf32> -> vector<16x64xf32>
    %33 = arith.index_cast %9 : i32 to index
    %34 = arith.index_cast %22 : i32 to index
    %c0_16 = arith.constant 0 : index
    %35 = vector.load %arg13[%33, %34, %c0_16] : memref<2x16x64xbf16, #tpu.memory_space<vmem>>, vector<1x16x64xbf16>
    %36 = vector.shape_cast %35 : vector<1x16x64xbf16> to vector<16x64xbf16>
    %37 = arith.extf %36 : vector<16x64xbf16> to vector<16x64xf32>
    %38 = arith.addf %32, %37 : vector<16x64xf32>
    %39 = arith.truncf %38 : vector<16x64xf32> to vector<16x64xbf16>
    %40 = arith.index_cast %arg0 : i32 to index
    %c0_17 = arith.constant 0 : index
    %c0_18 = arith.constant 0 : index
    %41 = vector.load %arg6[%40, %c0_17, %c0_18] : memref<3x64x64xbf16, #tpu.memory_space<vmem>>, vector<1x64x64xbf16>
    %42 = vector.shape_cast %41 : vector<1x64x64xbf16> to vector<64x64xbf16>
    %cst_19 = arith.constant dense<0.000000e+00> : vector<16x64xf32>
    %43 = tpu.matmul %39, %42, %cst_19 {dimension_numbers = #tpu.dot_dimension_numbers<[1], [0], [0], [1], [0, 0, 1, 1], [], []>} : vector<16x64xbf16>, vector<64x64xbf16>, vector<16x64xf32> -> vector<16x64xf32>
    %44 = arith.index_cast %arg0 : i32 to index
    %c0_20 = arith.constant 0 : index
    %c0_21 = arith.constant 0 : index
    %45 = vector.load %arg7[%44, %c0_20, %c0_21] : memref<3x1x64xf32, #tpu.memory_space<vmem>>, vector<1x1x64xf32>
    %46 = vector.shape_cast %45 : vector<1x1x64xf32> to vector<1x64xf32>
    %47 = vector.broadcast %46 : vector<1x64xf32> to vector<16x64xf32>
    %48 = arith.addf %43, %47 : vector<16x64xf32>
    %cst_22 = arith.constant 0.000000e+00 : f32
    %49 = vector.broadcast %cst_22 : f32 to vector<16x64xf32>
    %50 = arith.maximumf %48, %49 : vector<16x64xf32>
    %51 = arith.truncf %50 : vector<16x64xf32> to vector<16x64xbf16>
    %52 = arith.index_cast %arg0 : i32 to index
    %c0_23 = arith.constant 0 : index
    %c0_24 = arith.constant 0 : index
    %53 = vector.load %arg8[%52, %c0_23, %c0_24] : memref<3x64x64xbf16, #tpu.memory_space<vmem>>, vector<1x64x64xbf16>
    %54 = vector.shape_cast %53 : vector<1x64x64xbf16> to vector<64x64xbf16>
    %cst_25 = arith.constant dense<0.000000e+00> : vector<16x64xf32>
    %55 = tpu.matmul %51, %54, %cst_25 {dimension_numbers = #tpu.dot_dimension_numbers<[1], [0], [0], [1], [0, 0, 1, 1], [], []>} : vector<16x64xbf16>, vector<64x64xbf16>, vector<16x64xf32> -> vector<16x64xf32>
    %56 = arith.index_cast %arg0 : i32 to index
    %c0_26 = arith.constant 0 : index
    %c0_27 = arith.constant 0 : index
    %57 = vector.load %arg9[%56, %c0_26, %c0_27] : memref<3x1x64xf32, #tpu.memory_space<vmem>>, vector<1x1x64xf32>
    %58 = vector.shape_cast %57 : vector<1x1x64xf32> to vector<1x64xf32>
    %59 = vector.broadcast %58 : vector<1x64xf32> to vector<16x64xf32>
    %60 = arith.addf %55, %59 : vector<16x64xf32>
    %cst_28 = arith.constant 0.000000e+00 : f32
    %61 = vector.broadcast %cst_28 : f32 to vector<16x64xf32>
    %62 = arith.maximumf %60, %61 : vector<16x64xf32>
    %63 = arith.truncf %62 : vector<16x64xf32> to vector<16x64xbf16>
    %64 = arith.index_cast %20 : i32 to index
    %65 = arith.index_cast %22 : i32 to index
    %c0_29 = arith.constant 0 : index
    %66 = vector.load %arg13[%64, %65, %c0_29] : memref<2x16x64xbf16, #tpu.memory_space<vmem>>, vector<1x16x64xbf16>
    %67 = vector.shape_cast %66 : vector<1x16x64xbf16> to vector<16x64xbf16>
    %68 = vector.shape_cast %63 : vector<16x64xbf16> to vector<1x16x64xbf16>
    tpu.vector_store %arg13[%64, %65, %c0_29], %68 {strides = array<i32>} : memref<2x16x64xbf16, #tpu.memory_space<vmem>>, vector<1x16x64xbf16>,
    %c2_i32_30 = arith.constant 2 : i32
    %69 = arith.cmpi eq, %arg0, %c2_i32_30 : i32
    %c0_i32_31 = arith.constant 0 : i32
    %70 = arith.cmpi eq, %arg1, %c0_i32_31 : i32
    %71 = arith.andi %69, %70 : i1
    %72 = arith.extui %71 : i1 to i32
    %c0_i32_32 = arith.constant 0 : i32
    %73 = arith.cmpi ne, %72, %c0_i32_32 : i32
    scf.if %73 {
      %74 = arith.index_cast %20 : i32 to index
      %c0_33 = arith.constant 0 : index
      %c0_34 = arith.constant 0 : index
      %75 = vector.load %arg13[%74, %c0_33, %c0_34] : memref<2x16x64xbf16, #tpu.memory_space<vmem>>, vector<1x16x64xbf16>
      %76 = vector.shape_cast %75 : vector<1x16x64xbf16> to vector<16x64xbf16>
      %c0_35 = arith.constant 0 : index
      %c0_36 = arith.constant 0 : index
      %77 = vector.load %arg4[%c0_35, %c0_36] : memref<2x16xbf16, #tpu.memory_space<vmem>>, vector<2x16xbf16>
      %cst_37 = arith.constant dense<0.000000e+00> : vector<2x64xf32>
      %78 = tpu.matmul %77, %76, %cst_37 {dimension_numbers = #tpu.dot_dimension_numbers<[1], [0], [0], [1], [0, 0, 1, 1], [], []>} : vector<2x16xbf16>, vector<16x64xbf16>, vector<2x64xf32> -> vector<2x64xf32>
      %c0_38 = arith.constant 0 : index
      %c0_39 = arith.constant 0 : index
      %79 = vector.load %arg5[%c0_38, %c0_39] : memref<2x64xf32, #tpu.memory_space<vmem>>, vector<2x64xf32>
      %80 = arith.mulf %78, %79 : vector<2x64xf32>
      %81 = arith.truncf %80 : vector<2x64xf32> to vector<2x64xbf16>
      %c0_40 = arith.constant 0 : index
      %c0_41 = arith.constant 0 : index
      %c0_42 = arith.constant 0 : index
      %82 = vector.load %arg10[%c0_40, %c0_41, %c0_42] : memref<2x64x64xbf16, #tpu.memory_space<vmem>>, vector<1x64x64xbf16>
      %83 = vector.shape_cast %82 : vector<1x64x64xbf16> to vector<64x64xbf16>
      %cst_43 = arith.constant dense<0.000000e+00> : vector<2x64xf32>
      %84 = tpu.matmul %81, %83, %cst_43 {dimension_numbers = #tpu.dot_dimension_numbers<[1], [0], [0], [1], [0, 0, 1, 1], [], []>} : vector<2x64xbf16>, vector<64x64xbf16>, vector<2x64xf32> -> vector<2x64xf32>
      %c0_44 = arith.constant 0 : index
      %c0_45 = arith.constant 0 : index
      %c0_46 = arith.constant 0 : index
      %85 = vector.load %arg11[%c0_44, %c0_45, %c0_46] : memref<2x1x64xf32, #tpu.memory_space<vmem>>, vector<1x1x64xf32>
      %86 = vector.shape_cast %85 : vector<1x1x64xf32> to vector<1x64xf32>
      %87 = vector.broadcast %86 : vector<1x64xf32> to vector<2x64xf32>
      %88 = arith.addf %84, %87 : vector<2x64xf32>
      %89 = arith.mulf %88, %88 : vector<2x64xf32>
      %90 = arith.mulf %88, %89 : vector<2x64xf32>
      %cst_47 = arith.constant 4.471500e-02 : f32
      %91 = vector.broadcast %cst_47 : f32 to vector<2x64xf32>
      %92 = arith.mulf %91, %90 : vector<2x64xf32>
      %93 = arith.addf %88, %92 : vector<2x64xf32>
      %cst_48 = arith.constant 0.797884583 : f32
      %94 = vector.broadcast %cst_48 : f32 to vector<2x64xf32>
      %95 = arith.mulf %94, %93 : vector<2x64xf32>
      %96 = math.tanh %95 : vector<2x64xf32>
      %cst_49 = arith.constant 1.000000e+00 : f32
      %97 = vector.broadcast %cst_49 : f32 to vector<2x64xf32>
      %98 = arith.addf %97, %96 : vector<2x64xf32>
      %cst_50 = arith.constant 5.000000e-01 : f32
      %99 = vector.broadcast %cst_50 : f32 to vector<2x64xf32>
      %100 = arith.mulf %99, %98 : vector<2x64xf32>
      %101 = arith.mulf %88, %100 : vector<2x64xf32>
      %102 = arith.truncf %101 : vector<2x64xf32> to vector<2x64xbf16>
      %c1 = arith.constant 1 : index
      %c0_51 = arith.constant 0 : index
      %c0_52 = arith.constant 0 : index
      %103 = vector.load %arg10[%c1, %c0_51, %c0_52] : memref<2x64x64xbf16, #tpu.memory_space<vmem>>, vector<1x64x64xbf16>
      %104 = vector.shape_cast %103 : vector<1x64x64xbf16> to vector<64x64xbf16>
      %cst_53 = arith.constant dense<0.000000e+00> : vector<2x64xf32>
      %105 = tpu.matmul %102, %104, %cst_53 {dimension_numbers = #tpu.dot_dimension_numbers<[1], [0], [0], [1], [0, 0, 1, 1], [], []>} : vector<2x64xbf16>, vector<64x64xbf16>, vector<2x64xf32> -> vector<2x64xf32>
      %c1_54 = arith.constant 1 : index
      %c0_55 = arith.constant 0 : index
      %c0_56 = arith.constant 0 : index
      %106 = vector.load %arg11[%c1_54, %c0_55, %c0_56] : memref<2x1x64xf32, #tpu.memory_space<vmem>>, vector<1x1x64xf32>
      %107 = vector.shape_cast %106 : vector<1x1x64xf32> to vector<1x64xf32>
      %108 = vector.broadcast %107 : vector<1x64xf32> to vector<2x64xf32>
      %109 = arith.addf %105, %108 : vector<2x64xf32>
      %c0_57 = arith.constant 0 : index
      %c0_58 = arith.constant 0 : index
      %110 = vector.load %arg12[%c0_57, %c0_58] : memref<2x64xf32, #tpu.memory_space<vmem>>, vector<2x64xf32>
      tpu.vector_store %arg12[%c0_57, %c0_58], %109 {strides = array<i32>} : memref<2x64xf32, #tpu.memory_space<vmem>>, vector<2x64xf32>,
    } else {
    }
    return
  }
  func.func @transform_0(%arg0: i32, %arg1: i32) -> (i32, i32) {
    %c0_i32 = arith.constant 0 : i32
    %c0_i32_0 = arith.constant 0 : i32
    %c0_i32_1 = arith.constant 0 : i32
    return %c0_i32, %c0_i32_0 : i32, i32
  }
  func.func @transform_1(%arg0: i32, %arg1: i32) -> (i32, i32) {
    %c0_i32 = arith.constant 0 : i32
    %c0_i32_0 = arith.constant 0 : i32
    return %arg1, %c0_i32 : i32, i32
  }
  func.func @transform_2(%arg0: i32, %arg1: i32) -> (i32, i32) {
    %c0_i32 = arith.constant 0 : i32
    %c0_i32_0 = arith.constant 0 : i32
    %c0_i32_1 = arith.constant 0 : i32
    return %c0_i32, %c0_i32_0 : i32, i32
  }
  func.func @transform_3(%arg0: i32, %arg1: i32) -> (i32, i32) {
    %c0_i32 = arith.constant 0 : i32
    %c0_i32_0 = arith.constant 0 : i32
    %c0_i32_1 = arith.constant 0 : i32
    return %c0_i32, %c0_i32_0 : i32, i32
  }
  func.func @transform_4(%arg0: i32, %arg1: i32) -> (i32, i32, i32) {
    %c0_i32 = arith.constant 0 : i32
    %c0_i32_0 = arith.constant 0 : i32
    %c0_i32_1 = arith.constant 0 : i32
    %c0_i32_2 = arith.constant 0 : i32
    return %c0_i32, %c0_i32_0, %c0_i32_1 : i32, i32, i32
  }
  func.func @transform_5(%arg0: i32, %arg1: i32) -> (i32, i32, i32) {
    %c0_i32 = arith.constant 0 : i32
    %c0_i32_0 = arith.constant 0 : i32
    %c0_i32_1 = arith.constant 0 : i32
    %c0_i32_2 = arith.constant 0 : i32
    return %c0_i32, %c0_i32_0, %c0_i32_1 : i32, i32, i32
  }
  func.func @transform_6(%arg0: i32, %arg1: i32) -> (i32, i32, i32) {
    %c0_i32 = arith.constant 0 : i32
    %c0_i32_0 = arith.constant 0 : i32
    %c0_i32_1 = arith.constant 0 : i32
    %c0_i32_2 = arith.constant 0 : i32
    return %c0_i32, %c0_i32_0, %c0_i32_1 : i32, i32, i32
  }
  func.func @transform_7(%arg0: i32, %arg1: i32) -> (i32, i32, i32) {
    %c0_i32 = arith.constant 0 : i32
    %c0_i32_0 = arith.constant 0 : i32
    %c0_i32_1 = arith.constant 0 : i32
    %c0_i32_2 = arith.constant 0 : i32
    return %c0_i32, %c0_i32_0, %c0_i32_1 : i32, i32, i32
  }
  func.func @transform_8(%arg0: i32, %arg1: i32) -> (i32, i32, i32) {
    %c0_i32 = arith.constant 0 : i32
    %c0_i32_0 = arith.constant 0 : i32
    %c0_i32_1 = arith.constant 0 : i32
    %c0_i32_2 = arith.constant 0 : i32
    return %c0_i32, %c0_i32_0, %c0_i32_1 : i32, i32, i32
  }
  func.func @transform_9(%arg0: i32, %arg1: i32) -> (i32, i32, i32) {
    %c0_i32 = arith.constant 0 : i32
    %c0_i32_0 = arith.constant 0 : i32
    %c0_i32_1 = arith.constant 0 : i32
    %c0_i32_2 = arith.constant 0 : i32
    return %c0_i32, %c0_i32_0, %c0_i32_1 : i32, i32, i32
  }
  func.func @transform_10(%arg0: i32, %arg1: i32) -> (i32, i32) {
    %c0_i32 = arith.constant 0 : i32
    %c0_i32_0 = arith.constant 0 : i32
    %c0_i32_1 = arith.constant 0 : i32
    return %c0_i32, %c0_i32_0 : i32, i32
  }
}

</mosaic_0001>

<bundles_post_ra>
// kernel: tpu_custom_call.1
= control target key start
LH: loop header
LB: loop body
LE: loop exit
PB: predicated region body
PF: predicated region fallthrough
CT: control target
= control target key end

     0   :  { %s1720_s0 = inlined_call_operand.hbm [shape: bf16[16,64], index: 0, kind: input, shape index: {}]   ;;  %s1721_s1 = inlined_call_operand.hbm [shape: bf16[16,16], index: 1, kind: input, shape index: {}]   ;;  %s1722_s2 = inlined_call_operand.hbm [shape: bf16[2,16], index: 2, kind: input, shape index: {}]   ;;  %s1723_s3 = inlined_call_operand.hbm [shape: f32[2,64], index: 3, kind: input, shape index: {}]   ;;  %s1724_s4 = inlined_call_operand.hbm [shape: bf16[3,64,64], index: 4, kind: input, shape index: {}]   ;;  %s1725_s5 = inlined_call_operand.vmem [shape: f32[3,1,64], index: 5, kind: input, shape index: {}]   ;;  %s1726_s6 = inlined_call_operand.hbm [shape: bf16[3,64,64], index: 6, kind: input, shape index: {}]   ;;  %s1727_s7 = inlined_call_operand.vmem [shape: f32[3,1,64], index: 7, kind: input, shape index: {}]   ;;  %s1728_s8 = inlined_call_operand.hbm [shape: bf16[2,64,64], index: 8, kind: input, shape index: {}]   ;;  %s1729_s9 = inlined_call_operand.vmem [shape: f32[2,1,64], index: 9, kind: input, shape index: {}]   ;;  %s1730_s10 = inlined_call_operand.hbm [shape: f32[2,64], index: 10, kind: output, shape index: {}]  }
   0x1   :  { %1732 = sst [smem:[#allocation21_spill]] %s1720_s0 }
   0x2   :  { %1733 = sst [smem:[#allocation22_spill]] %s1721_s1 }
   0x3   :  { %15 = vsyncpa [#allocation4], 0 }
   0x4   :  { %16 = vsyncpa [#allocation7], 0 }
   0x5   :  { %17 = vsyncpa [#allocation10], 0 }
   0x6   :  { %18 = vsyncpa [#allocation13], 0 }
   0x7   :  { %19 = vsyncpa [#allocation5], 0  ;;  %s1567_s13 = smov 0   ;;  %s1569_s14 = smov 0  }
   0x8   :  { %s1571_s15 = smov 0  }
   0x9 LB: > { %s1731_s16 = sadd.s32 4294967295, %s1500_s15   ;;  %p959_p0 = scmp.ge.s32.totalorder %s1500_s15, 1  ;;  %s1500_s15 = sphi %s1571_s15, %s25_s15   ;;  %s1496_s14 = sphi %s1569_s14, %s1741_s14   ;;  %s1492_s13 = sphi %s1567_s13, %s1740_s13  }
   0xa   : > { %p278_p1 = scmp.lt.s32.totalorder %s1500_s15, 4  ;;  %p1587_p2 = scmp.eq.s32.totalorder %s1731_s16, 0 }
   0xb   : > { %s1735_s1 = sld [smem:[#allocation22_spill]]  ;;  %s333_s24 = sshll.u32 %s1723_s3, 4  ;;  %s334_s24 = int_to_ptr.hbm [resolvable:$true] %s333_s24 }
   0xc   : > { %p1594_p3 = pnand %p959_p0, %p278_p1  ;;  %s1502_s25 = smov [#allocation6]  }
   0xd   : > { %s308_s26 = sshll.u32 %s1502_s25, 4  ;;  %s1503_s28 = smov [#allocation9]   ;;  %s309_s26 = int_to_ptr.vmem [resolvable:$true] %s308_s26 }
   0xe   : > { %p1142_p4 = pneg %p1594_p3  ;;  %s335_s29 = sshll.u32 %s1503_s28, 4  ;;  %s336_s29 = int_to_ptr.vmem [resolvable:$true] %s335_s29 }
   0xf   : > { %s361_s12 = sshll.u32 %s1726_s6, 4  ;;  %s1504_s18 = smov 64   ;;  %s362_s12 = int_to_ptr.hbm [resolvable:$true] %s361_s12 }
  0x10   : > { %p1605_p5 = pnand %p1587_p2, %p1142_p4  ;;  %s1505_s19 = smov 4  }
  0x11   : > { %s306_s20 = sshll.u32 %s1735_s1, 4  ;;  %s1506_s22 = smov [#allocation12]   ;;  %s307_s20 = int_to_ptr.hbm [resolvable:$true] %s306_s20 }
  0x12   : > { %1148 = dma.hbm_to_vmem [thread:$0]  (!%p1605_p5), %s307_s20, 128, %s309_s26, [#allocation7], %s1504_s18, %s1504_s18, %s1505_s19  }
  0x13   : > { %1154 = dma.hbm_to_vmem [thread:$0]  (!%p1605_p5), %s334_s24, 32, %s336_s29, [#allocation10]  }
  0x14   : > { %s363_s23 = sshll.u32 %s1506_s22, 4  ;;  %s37_s25 = sadd.s32 1, %s1496_s14  ;;  %s364_s23 = int_to_ptr.vmem [resolvable:$true] %s363_s23 }
  0x15   : > { %1160 = dma.hbm_to_vmem [thread:$0]  (!%p1605_p5), %s362_s12, 1536, %s364_s23, [#allocation13], %s1504_s18, %s1504_s18, %s1505_s19  }
  0x16   : > { %s1738_s0 = sld [smem:[#allocation21_spill]]  ;;  %p39_p6 = scmp.ge.s32.totalorder %s37_s25, 3 }
  0x17   : > { %s321_s26 = sshll.u32 %s1722_s2, 4  ;;  %s1507_s29 = smov [#allocation3]   ;;  %s322_s26 = int_to_ptr.hbm [resolvable:$true] %s321_s26 }
  0x18   : > { %s1743_s25 = smov (%p39_p6, %s37_s25), 0  ;;  %s291_s22 = sshll.u32 %s1507_s29, 4  ;;  %s292_s22 = int_to_ptr.vmem [resolvable:$true] %s291_s22 }
  0x19   : > { %s1508_s12 = smov [#allocation8]   ;;  %s344_s20 = sshll.u32 %s1724_s4, 4  ;;  %s345_s20 = int_to_ptr.hbm [resolvable:$true] %s344_s20 }
  0x1a   : > { %s323_s23 = sshll.u32 %s1508_s12, 4  ;;  %s378_s16 = sshll.u32 %s1728_s8, 4  ;;  %s324_s23 = int_to_ptr.vmem [resolvable:$true] %s323_s23  ;;  %s379_s16 = int_to_ptr.hbm [resolvable:$true] %s378_s16 }
  0x1b   : > { %1151 = dma.hbm_to_vmem [thread:$0]  (!%p1605_p5), %s322_s26, 16, %s324_s23, [#allocation7]  }
  0x1c   : > { %s289_s11 = sshll.u32 %s1738_s0, 4  ;;  %s1509_s0 = smov [#allocation11]   ;;  %s290_s11 = int_to_ptr.hbm [resolvable:$true] %s289_s11 }
  0x1d   : > { %1145 = dma.hbm_to_vmem [thread:$0]  (!%p1605_p5), %s290_s11, 128, %s292_s22, [#allocation4], %s1504_s18, %s1504_s18, %s1505_s19  }
  0x1e   : > { %s346_s1 = sshll.u32 %s1509_s0, 4  ;;  %s1510_s11 = smov [#allocation14]   ;;  %s347_s1 = int_to_ptr.vmem [resolvable:$true] %s346_s1 }
  0x1f   : > { %1157 = dma.hbm_to_vmem [thread:$0]  (!%p1605_p5), %s345_s20, 1536, %s347_s1, [#allocation10], %s1504_s18, %s1504_s18, %s1505_s19  }
  0x20   : > { %s380_s22 = sshll.u32 %s1510_s11, 4  ;;  %399 = sbr.rel (%p1594_p3) target bundleno = 927 (0x39f), region = 60  ;;  %s381_s22 = int_to_ptr.vmem [resolvable:$true] %s380_s22 }
  0x21   : > { %1163 = dma.hbm_to_vmem [thread:$0]  (!%p1605_p5), %s379_s16, 1024, %s381_s22, [#allocation13], %s1504_s18, %s1504_s18, %s1505_s19  }
  0x25   : > { %1471 = dma.done.wait (%p1587_p2), [#allocation4], 128  }
  0x26   : > { %1473 = vsyncadd (%p1587_p2), [#allocation4], 4294967168 }
  0x27   : > { %1475 = dma.done.wait (%p1587_p2), [#allocation7], 144  }
  0x28   : > { %1477 = vsyncadd (%p1587_p2), [#allocation7], 4294967152 }
  0x29   : > { %1479 = dma.done.wait (%p1587_p2), [#allocation10], 1568  }
  0x2a   : > { %1481 = vsyncadd (%p1587_p2), [#allocation10], 4294965728 }
  0x2b   : > { %1483 = dma.done.wait (%p1587_p2), [#allocation13], 2560  }
  0x2c   : > { %1485 = vsyncadd (%p1587_p2), [#allocation13], 4294964736  ;;  %p460_p7 = scmp.lt.s32.totalorder %s1492_s13, 0  ;;  %s461_s0 = ssub.s32 0, %s1492_s13 }
  0x2d   : > { %s975_s1 = smin.u32 %s1492_s13, %s461_s0  ;;  %s472_s16 = sadd.s32 1, %s1492_s13 }
  0x2e   : > { %s463_s21 = sand.u32 1, %s975_s1   ;;  %p473_p8 = scmp.lt.s32.totalorder %s472_s16, 0 }
  0x2f   : > { %s464_s27 = ssub.s32 0, %s463_s21  ;;  %s474_s18 = ssub.s32 0, %s472_s16 }
  0x30   : > { %s1745_s27 = smov (!%p460_p7, %s464_s27), %s463_s21  ;;  %s978_s19 = smin.u32 %s474_s18, %s472_s16 }
  0x31   : > { %p486_p9 = scmp.eq.s32.totalorder %s1492_s13, 0  ;;  %p977_p10 = scmp.lt.s32.totalorder %s1745_s27, 0 }
  0x32   : > { %s470_s26 = sadd.s32 2, %s1745_s27  ;;  %s476_s17 = sand.u32 1, %s978_s19   ;;  %v492_v0 = vld [vmem:[#allocation3] sm:$0xf] (%p486_p9)  ;;  %vm494_vm0 = vcmask (%p486_p9), 519168  }
  0x33   : > { %s1747_s26 = smov (!%p977_p10, %s470_s26), %s1745_s27  ;;  %s477_s12 = ssub.s32 0, %s476_s17  ;;  %v493_v1 = vld [vmem:[#allocation3 + $0x4] sm:$0xf] (%p486_p9)  ;;  %495 = vst.msk [vmem:[#allocation2] sm:$0xf] (%p486_p9), %vm494_vm0, %v492_v0 }
  0x34   : > { %s1749_s12 = smov (!%p473_p8, %s477_s12), %s476_s17  ;;  %491 = sbr.rel (!%p486_p9) target bundleno = 57 (0x39), region = 92  ;;  %496 = vst.msk [vmem:[#allocation2 + $0x4] sm:$0xf] (%p486_p9), %vm494_vm0, %v493_v1 }
  0x35   : > { %p980_p11 = scmp.lt.s32.totalorder %s1749_s12, 0  ;;  %s483_s23 = sadd.s32 2, %s1749_s12 }
  0x37   : > { %s1751_s23 = smov (!%p980_p11, %s483_s23), %s1749_s12 }
  0x39 PF: > { %s1080_s28 = sshll.u32 %s1747_s26, 3  ;;  %s1084_s30 = sshll.u32 %s1492_s13, 5  ;;  %v1082_v4 = vld [vmem:[#allocation6] sm:$0xff]  ;;  %vm524_vm1 = vcmask 130048   ;;  %vm583_vm2 = vcmask 523264   ;;  %vm668_vm3 = vcmask 519168  }
  0x3a   : > { %s499_s20 = scalar_lea.vmem [#allocation2], %s1080_s28  ;;  %s545_s24 = scalar_lea.vmem [#allocation11], %s1084_s30 }
  0x3b   : > { %v1081_v2 = vld [vmem:[%s499_s20] sm:$0xff]  ;;  %v1088_v3 = vld [vmem:[%s545_s24 + $0x18] sm:$0xff]  ;;  %s554_s22 = scalar_lea.vmem %s1725_s5, %s1492_s13  ;;  %v1087_v5 = vld [vmem:[%s545_s24 + $0x10] sm:$0xff]  ;;  %s614_s16 = scalar_lea.vmem %s1727_s7, %s1492_s13 }
  0x3c   : > { %535 = vmatpush.bf16.msra.mxu0 %v1081_v2  ;;  %591 = vmatpush.bf16.msra.mxu1 %v1088_v3  ;;  %v1086_v6 = vld [vmem:[%s545_s24 + $0x8] sm:$0xff]  ;;  %v1085_v7 = vld [vmem:[%s545_s24] sm:$0xff]  ;;  %s605_s21 = scalar_lea.vmem [#allocation12], %s1084_s30  ;;  %p671_p12 = scmp.eq.s32.totalorder %s1492_s13, 2 }
  0x3d   : > { %v1107_v9 = vld [vmem:[%s499_s20] sm:$0xff]   ;;  %v1093_v16 = vld [vmem:[%s605_s21 + $0x18] sm:$0xff]  ;;  %v1092_v17 = vld [vmem:[%s605_s21 + $0x10] sm:$0xff]  ;;  %s1094_s27 = sshll.u32 %s1751_s23, 3  ;;  %vm822_vm4 = vcmask (%p671_p12), 517120  }
  0x3e   : > { %v1108_v10 = vunpack.c.l.bf16 %v1107_v9  ;;  %v1109_v11 = vunpack.c.h.bf16 %v1107_v9  ;;  %650 = vmatpush.bf16.msra.mxu2 %v1093_v16  ;;  %v1091_v18 = vld [vmem:[%s605_s21 + $0x8] sm:$0xff]  ;;  %v1090_v19 = vld [vmem:[%s605_s21] sm:$0xff]  ;;  %s667_s18 = scalar_lea.vmem [#allocation2], %s1094_s27  ;;  %v1100_v40 = vld [vmem:[#allocation14 + $0x10] sm:$0xff] (%p671_p12) }
  0x3f   : > { %993 = vmatmul.msk.bf16.vlgmr.msra.gmra.mxu0 %vm524_vm1, %v1082_v4  ;;  %v1214_v21 = vld [vmem:[%s554_s22] ss:$0 sm:$0xff]  ;;  %v1099_v41 = vld [vmem:[#allocation14 + $0x8] sm:$0xff] (%p671_p12)  ;;  %v1098_v42 = vld [vmem:[#allocation14] sm:$0xff] (%p671_p12) }
  0x40   : > { %592 = vmatpush.bf16.msra.mxu1 %v1087_v5  ;;  %v1215_v28 = vld [vmem:[%s614_s16] ss:$0 sm:$0xff]  ;;  %v703_v43 = vld [vmem:[#allocation9] sm:$0x3] (%p671_p12)  ;;  %v1104_v49 = vld [vmem:[#allocation14 + $0x30] sm:$0xff] (%p671_p12) }
  0x41   : > { %v1101_v38 = vld [vmem:[#allocation14 + $0x18] sm:$0xff] (%p671_p12)  ;;  %v1103_v50 = vld [vmem:[#allocation14 + $0x28] sm:$0xff] (%p671_p12)  ;;  %v1102_v51 = vld [vmem:[#allocation14 + $0x20] sm:$0xff] (%p671_p12) }
  0x42   : > { %651 = vmatpush.bf16.msra.mxu2 %v1092_v17  ;;  %v680_v39 = vld [vmem:[#allocation8] sm:$0x1] (%p671_p12)  ;;  %v1217_v2 = vld [vmem:[%s1729_s9 + $0x1] ss:$0 sm:$0xff] (%p671_p12) }
  0x43   : > { %v1105_v48 = vld [vmem:[#allocation14 + $0x38] sm:$0xff] (%p671_p12) }
  0x44   : > { %593 = vmatpush.bf16.msra.mxu1 %v1086_v6  ;;  %v1216_v52 = vld [vmem:[%s1729_s9] ss:$0 sm:$0xff] (%p671_p12) }
  0x46   : > { %652 = vmatpush.bf16.msra.mxu2 %v1091_v18 }
  0x48   : > { %594 = vmatpush.bf16.msra.mxu1 %v1085_v7 }
  0x4a   : > { %653 = vmatpush.bf16.msra.mxu2 %v1090_v19 }
  0xbc   : > { %v537_v8 = vpop.f32.mrf.mxu0 }
  0xbd   : > { %v538_v13 = vadd.f32 %v1108_v10, %v537_v8 }
  0xc4   : > { %v539_v12 = vpop.f32.mrf.mxu0 }
  0xc5   : > { %v540_v14 = vadd.f32 %v1109_v11, %v539_v12 }
  0xc7   : > { %v542_v15 = vpack.c.bf16 %v540_v14, %v538_v13 }
  0xc9   : > { %1012 = vmatmul.msk.bf16.vlgmr.msra.gmra.mxu1 %vm583_vm2, %v542_v15 }
  0xca   : > { %749 = vmatpush.bf16.msra.mxu1 (%p671_p12), %v1101_v38 }
  0xce   : > { %750 = vmatpush.bf16.msra.mxu1 (%p671_p12), %v1100_v40 }
  0xd2   : > { %751 = vmatpush.bf16.msra.mxu1 (%p671_p12), %v1099_v41 }
  0xd6   : > { %752 = vmatpush.bf16.msra.mxu1 (%p671_p12), %v1098_v42 }
 0x146   : > { %v596_v20 = vpop.f32.mrf.mxu1 }
 0x147   : > { %v597_v22 = vadd.f32 %v1214_v21, %v596_v20 }
 0x149   : > { %v601_v25 = vmax.f32 %v597_v22, 0.0 }
 0x14e   : > { %v598_v23 = vpop.f32.mrf.mxu1 }
 0x14f   : > { %v599_v24 = vadd.f32 %v1214_v21, %v598_v23 }
 0x151   : > { %v602_v26 = vmax.f32 %v599_v24, 0.0 }
 0x153   : > { %v603_v27 = vpack.c.bf16 %v602_v26, %v601_v25 }
 0x155   : > { %1030 = vmatmul.msk.bf16.vlgmr.msra.gmra.mxu2 %vm583_vm2, %v603_v27 }
 0x156   : > { %813 = vmatpush.bf16.msra.mxu2 (%p671_p12), %v1105_v48 }
 0x15a   : > { %814 = vmatpush.bf16.msra.mxu2 (%p671_p12), %v1104_v49 }
 0x15e   : > { %815 = vmatpush.bf16.msra.mxu2 (%p671_p12), %v1103_v50 }
 0x162   : > { %816 = vmatpush.bf16.msra.mxu2 (%p671_p12), %v1102_v51 }
 0x1d8   : > { %v655_v29 = vpop.f32.mrf.mxu2 }
 0x1d9   : > { %v656_v30 = vadd.f32 %v1215_v28, %v655_v29 }
 0x1db   : > { %v660_v31 = vmax.f32 %v656_v30, 0.0 }
 0x1dd   : > { %v662_v32 = vpack.c.bf16 %v660_v31, %v660_v31 }
 0x1df   : > { %669 = vst.msk [vmem:[%s667_s18] sm:$0xf] %vm668_vm3, %v662_v32 }
 0x1e0   : > { %v657_v33 = vpop.f32.mrf.mxu2 }
 0x1e1   : > { %v658_v34 = vadd.f32 %v1215_v28, %v657_v33 }
 0x1e3   : > { %v661_v35 = vmax.f32 %v658_v34, 0.0  ;;  %675 = sbr.rel (!%p671_p12) target bundleno = 921 (0x399), region = 96 }
 0x1e5   : > { %v663_v36 = vpack.c.bf16 %v661_v35, %v661_v35 }
 0x1e7   : > { %670 = vst.msk [vmem:[%s667_s18 + $0x4] sm:$0xf] %vm668_vm3, %v663_v36 }
 0x1ee   : > { %v1097_v37 = vld [vmem:[%s667_s18] sm:$0xff] }
 0x1ef   : > { %697 = vmatpush.bf16.msra.mxu0 %v1097_v37 }
 0x1f2   : > { %1039 = vmatmul.msk.bf16.vlgmr.msra.gmra.mxu0 %vm524_vm1, %v680_v39 }
 0x26f   : > { %v699_v44 = vpop.f32.mrf.mxu0 }
 0x270   : > { %v704_v45 = vmul.f32 %v703_v43, %v699_v44 }
 0x272   : > { %v705_v46 = vpack.c.bf16 %v704_v45, %v704_v45 }
 0x274   : > { %1056 = vmatmul.msk.bf16.vlgmr.msra.gmra.mxu1 %vm583_vm2, %v705_v46 }
 0x277   : > { %v701_v47 = vpop.f32.mrf.mxu0 }
 0x2f1   : > { %v754_v53 = vpop.f32.mrf.mxu1 }
 0x2f2   : > { %v755_v54 = vadd.f32 %v1216_v52, %v754_v53 }
 0x2f4   : > { %v758_v55 = vmul.f32 %v755_v54, %v755_v54 }
 0x2f6   : > { %v759_v56 = vmul.f32 %v758_v55, %v755_v54 }
 0x2f8   : > { %v760_v57 = vmul.f32 0.044715, %v759_v56 }
 0x2f9   : > { %v756_v58 = vpop.f32.mrf.mxu1 }
 0x2fa   : > { %v761_v59 = vadd.f32 %v760_v57, %v755_v54 }
 0x2fc   : > { %v762_v60 = vmul.f32 0.7978846, %v761_v59 }
 0x2fe   : > { %1218 = vtanh.f32 %v762_v60 }
 0x304   : > { %v1219_v61 = vpop.eup %1218 }
 0x305   : > { %v764_v62 = vadd.f32 1.0, %v1219_v61 }
 0x307   : > { %v765_v63 = vmul.f32 0.5, %v764_v62 }
 0x309   : > { %v766_v0 = vmul.f32 %v765_v63, %v755_v54 }
 0x30b   : > { %v767_v1 = vpack.c.bf16 %v766_v0, %v766_v0 }
 0x30d   : > { %1074 = vmatmul.msk.bf16.vlgmr.msra.gmra.mxu2 %vm583_vm2, %v767_v1 }
 0x390   : > { %v818_v3 = vpop.f32.mrf.mxu2 }
 0x391   : > { %v819_v4 = vadd.f32 %v1217_v2, %v818_v3 }
 0x393   : > { %823 = vst.msk [vmem:[#allocation15] sm:$0x3] %vm822_vm4, %v819_v4 }
 0x398   : > { %v820_v5 = vpop.f32.mrf.mxu2 }
 0x399 PF: > { %s1739_s12 = sadd.s32 4294967295, %s1500_s15   ;;  %s832_s30 = sshll.u32 %s1730_s10, 4  ;;  %s833_s30 = int_to_ptr.hbm [resolvable:$true] %s832_s30 }
 0x39a   : > { %p1178_p13 = scmp.eq.s32.totalorder %s1739_s12, 2  ;;  %s1511_s20 = smov [#allocation15]  }
 0x39b   : > { %s830_s24 = sshll.u32 %s1511_s20, 4  ;;  %s831_s24 = int_to_ptr.vmem [resolvable:$true] %s830_s24 }
 0x39c   : > { %1139 = dma.vmem_to_hbm [thread:$0]  (%p1178_p13), %s831_s24, 32, %s833_s30, [#allocation5]  }
 0x39d   : > { %1487 = dma.done.wait (%p1178_p13), [#allocation5], 32  }
 0x39e   : > { %1489 = vsyncadd (%p1178_p13), [#allocation5], 4294967264 }
 0x39f PF: > { %s25_s15 = sadd.s32 1, %s1500_s15   ;;  %s1740_s13 = smov %s1496_s14 }
 0x3a0   : > { %p22_p0 = scmp.ge.s32.totalorder %s25_s15, 5   ;;  %s1741_s14 = smov %s1743_s25 }
 0x3a2   :  { %24 = sbr.rel (!%p22_p0) target bundleno = 9 (0x9), region = 132 }
 0x3a7   :  { %846 = vsyncpa [#allocation4], 1 }
 0x3a8   :  { %848 = vsyncpa [#allocation4 + $0x1], 1 }
 0x3a9   :  { %849 = vsyncpa [#allocation7], 1 }
 0x3aa   :  { %850 = vsyncpa [#allocation10], 1 }
 0x3ab   :  { %851 = vsyncpa [#allocation13], 1 }
 0x3ac   :  { %852 = vsyncpa [#allocation5], 1 }
 0x3ad   :  { %854 = vsyncpa [#allocation5 + $0x1], 1 }

</bundles_post_ra>
